<compile_context>
chip_gen: v7x
topology: tpu7x:2x2x1
jax: 0.10.0
libtpu: 0.0.40
codegen_flags: <defaults>
</compile_context>

<pallas_src>
import functools
import itertools

import numpy as np
import jax
import jax.numpy as jnp
from jax.experimental import pallas as pl
from jax.experimental.pallas import tpu as pltpu


# ----------------------------------------------------------------------------
# Feature map definition (static, Python-side)
# ----------------------------------------------------------------------------
def total_degree_exponents(dim, order):
    """All monomial exponent tuples with 1 <= total degree <= order."""
    exps = []
    for deg in range(1, order + 1):
        for combo in itertools.combinations_with_replacement(range(dim), deg):
            e = [0] * dim
            for i in combo:
                e[i] += 1
            exps.append(tuple(e))
    return exps


def build_derivative_basis(poly_exps, dim):
    """Static structure of d/dy_j of the polynomial feature map.

    Returns:
      E_np: (dim, n_d) int exponent matrix of the distinct derivative monomials.
      G:    (n_poly, n_d, dim) float; A = einsum('k,kmj->mj', c_poly, G) gives
            the coefficient matrix so that dE_poly[z, j] = sum_m A[m, j] psi_m(y_z).
    """
    d_index, d_exps, entries = {}, [], []
    for k, exps in enumerate(poly_exps):
        for j in range(dim):
            e = exps[j]
            if e == 0:
                continue
            d = list(exps)
            d[j] -= 1
            d = tuple(d)
            if d not in d_index:
                d_index[d] = len(d_exps)
                d_exps.append(d)
            entries.append((k, d_index[d], j, float(e)))
    G = np.zeros((len(poly_exps), max(len(d_exps), 1), dim), np.float32)
    for k, m, j, coeff in entries:
        G[k, m, j] += coeff
    if d_exps:
        E_np = np.asarray(d_exps, np.int32).T          # (dim, n_d)
    else:
        E_np = np.zeros((dim, 1), np.int32)
    return E_np, G


# ----------------------------------------------------------------------------
# Pallas kernel (transposed layout: batch Z in lanes)
# ----------------------------------------------------------------------------
def _odefunc_gnn_kernel(E_np, yT_ref, slab_ref, out_ref):
    # E_np is a *static* numpy table used only for Python loop structure.
    yT = yT_ref[...]                          # (dim, TZ)  lane-dense
    dim, _ = yT.shape
    n_d = E_np.shape[1]
    npairs = dim * (dim + 1) // 2

    slab = slab_ref[...]                      # (dim, n_d + 2 + dim + npairs)
    AT   = slab[:, 0:n_d]                     # (dim, n_d)   = A^T (c folded in)
    trg  = slab[:, n_d:n_d + 2]               # (dim, 2)     [sin-coeff, cos-coeff]
    Lfx  = slab[:, n_d + 2:n_d + 2 + dim]     # (dim, dim)   fixed L
    Wsym = slab[:, n_d + 2 + dim:]            # (dim, npairs) symmetrized zeta(dS)

    # --- dE^T (dim, TZ): trig part + polynomial-derivative part ---
    dE = trg[:, 0:1] * jnp.cos(yT) - trg[:, 1:2] * jnp.sin(yT)
    for m in range(n_d):
        col = AT[:, m:m + 1]                  # (dim, 1)
        row = None                            # derivative monomial psi_m(y)
        for i in range(dim):
            for _ in range(int(E_np[i, m])):
                r = yT[i:i + 1, :]            # (1, TZ)
                row = r if row is None else row * r
        dE = dE + (col if row is None else col * row)

    # --- LdE^T = L @ dE: columns of L times rows of dE (VPU FMA chain) ---
    LdE = Lfx[:, 0:1] * dE[0:1, :]
    for b in range(1, dim):
        LdE = LdE + Lfx[:, b:b + 1] * dE[b:b + 1, :]

    # --- MdS^T: quadratic form over symmetric dE pair products ---
    #   MdS[a, z] = sum_{b<=n} Wsym[a, (b,n)] * dE[b, z] * dE[n, z]
    MdS = None
    p = 0
    for b in range(dim):
        for n in range(b, dim):
            prod = dE[b:b + 1, :] * dE[n:n + 1, :]       # (1, TZ)
            term = Wsym[:, p:p + 1] * prod               # (dim, TZ)
            MdS = term if MdS is None else MdS + term
            p += 1

    dEMdS = jnp.sum(dE * MdS, axis=0, keepdims=True)     # (1, TZ)
    dSMdS = MdS[dim - 1:dim, :]                          # (1, TZ)  (dS is one-hot)

    out_ref[0:dim, :] = LdE + MdS                        # output (transposed)
    out_ref[dim:dim + 1, :] = dEMdS
    out_ref[dim + 1:dim + 2, :] = dSMdS


# ----------------------------------------------------------------------------
# Wrapper: parameter prep (done once in XLA) + pallas_call with Z grid
# ----------------------------------------------------------------------------
def ode_func_gnn_forward(y, c_weight, d_m, l_m, l_fixed, poly_exps, *, tz=None):
    y = y.astype(jnp.float32)
    Z, dim = y.shape
    n_poly = len(poly_exps)
    npairs = dim * (dim + 1) // 2

    # --- static derivative-basis structure + fold c into coefficient matrices
    E_np, G = build_derivative_basis(poly_exps, dim)
    n_d = E_np.shape[1]

    c = c_weight.astype(jnp.float32).reshape(-1)
    A = jnp.einsum('k,kmj->mj', c[:n_poly], jnp.asarray(G, jnp.float32))  # (n_d, dim)
    AT = A.T                                                              # (dim, n_d)
    trig = jnp.stack([c[n_poly:n_poly + dim],                             # sin coeffs
                      c[n_poly + dim:n_poly + 2 * dim]], axis=1)          # (dim, 2)

    # --- parameter-only math done once, outside the kernel
    l_m = l_m.astype(jnp.float32)
    Lm = (l_m - jnp.transpose(l_m, (1, 0, 2))) * 0.5                      # (dim, dim, D1)
    Dmat = d_m.astype(jnp.float32) @ d_m.astype(jnp.float32).T            # (D1, D1)
    # W[a,b,n] = zeta[a,b,dim-1,n]  (dS one-hot at the last coordinate)
    W = jnp.einsum('abp,pq,nq->abn', Lm, Dmat, Lm[dim - 1])               # (dim, dim, dim)
    cols = []
    for b in range(dim):
        for n in range(b, dim):
            cols.append(W[:, b, b] if n == b else W[:, b, n] + W[:, n, b])
    Wsym = jnp.stack(cols, axis=1)                                        # (dim, npairs)

    Lfx = l_fixed.astype(jnp.float32)                                     # (dim, dim)

    # one packed parameter slab -> single extra DMA stream
    slab = jnp.concatenate([AT, trig, Lfx, Wsym], axis=1)
    slab_w = n_d + 2 + dim + npairs

    yT = y.T                                                              # (dim, Z)

    # --- block size chosen by bytes (~2 MiB of output per grid step)
    if tz is None:
        target_bytes = 2 << 20
        tz = (target_bytes // ((dim + 2) * 4)) // 128 * 128
        tz = max(128, tz)
        if tz >= Z or Z % tz != 0:
            tz = Z
    assert Z % tz == 0
    assert tz == Z or tz % 128 == 0
    grid = (Z // tz,)

    kernel = functools.partial(_odefunc_gnn_kernel, E_np)

    out_all = pl.pallas_call(
        kernel,
        out_shape=jax.ShapeDtypeStruct((dim + 2, Z), jnp.float32),
        grid=grid,
        in_specs=[
            pl.BlockSpec((dim, tz), lambda i: (0, i)),         # y^T tile
            pl.BlockSpec((dim, slab_w), lambda i: (0, 0)),     # packed params
        ],
        out_specs=pl.BlockSpec((dim + 2, tz), lambda i: (0, i)),
        compiler_params=pltpu.CompilerParams(
            dimension_semantics=("parallel",)),
    )(yT, slab)

    out = out_all[:dim, :].T                      # (Z, dim)
    dEMdS = out_all[dim, :][:, None]              # (Z, 1)
    dSMdS = out_all[dim + 1, :][:, None]          # (Z, 1)
    return out, dEMdS, dSMdS


# ----------------------------------------------------------------------------
# Pure-JAX / numpy reference (jax.grad for dE, np.einsum for the rest)
# ----------------------------------------------------------------------------
def _reference(y, c_weight, d_m, l_m, l_fixed, poly_exps):
    dim = y.shape[1]

    def features(yy):
        cols = []
        for exps in poly_exps:
            t = jnp.ones_like(yy[:, 0])
            for i, e in enumerate(exps):
                t = t * yy[:, i] ** e
            cols.append(t)
        for i in range(dim):
            cols.append(jnp.sin(yy[:, i]))
        for i in range(dim):
            cols.append(jnp.cos(yy[:, i]))
        return jnp.stack(cols, axis=-1)

    energy = lambda yy: jnp.sum(features(yy) @ c_weight)
    dE = np.asarray(jax.grad(energy)(y), dtype=np.float64)
    dS = np.zeros_like(dE)
    dS[:, -1] = 1.0

    Lnp = np.asarray(l_fixed, dtype=np.float64)
    Dnp = np.asarray(d_m, dtype=np.float64)
    Lmnp = np.asarray(l_m, dtype=np.float64)

    D = Dnp @ Dnp.T
    Lm = (Lmnp - np.transpose(Lmnp, (1, 0, 2))) / 2.0
    zeta = np.einsum('abm,mn,cdn->abcd', Lm, D, Lm)
    MdS = np.einsum('abmn,zb,zm,zn->za', zeta, dE, dS, dE)
    LdE = dE @ Lnp.T
    out = LdE + MdS
    dEMdS = np.einsum('za,za->z', dE, MdS)[:, None]
    dSMdS = np.einsum('za,za->z', dS, MdS)[:, None]
    return out, dEMdS, dSMdS


# ----------------------------------------------------------------------------
if __name__ == "__main__":
    # small shapes consistent with the module (2 balanced grid steps of 128)
    Z, dim, order, D1, D2 = 256, 4, 2, 3, 5

    poly_exps = total_degree_exponents(dim, order)
    nterms = len(poly_exps) + 2 * dim                 # TotalDegreeTrig.nterms

    key = jax.random.PRNGKey(0)
    k_y, k_c, k_dm, k_lm = jax.random.split(key, 4)

    y = jax.random.normal(k_y, (Z, dim), jnp.float32)                 # state
    c_weight = 0.1 * jax.random.normal(k_c, (nterms,), jnp.float32)   # nn.Linear(nterms,1,bias=False)
    d_m = jax.random.normal(k_dm, (D1, D2), jnp.float32)              # self.D_M
    l_m = jax.random.normal(k_lm, (dim, dim, D1), jnp.float32)        # self.L_M

    l_fixed = np.zeros((dim, dim), dtype=np.float32)                  # self.L
    l_fixed[0, 1], l_fixed[1, 0] = 1.0, -1.0
    l_fixed = jnp.asarray(l_fixed)

    out, dEMdS, dSMdS = ode_func_gnn_forward(
        y, c_weight, d_m, l_m, l_fixed, poly_exps, tz=128)
    jax.block_until_ready((out, dEMdS, dSMdS))

    ref_out, ref_dE, ref_dS = _reference(y, c_weight, d_m, l_m, l_fixed, poly_exps)
    np.testing.assert_allclose(np.asarray(out), ref_out, rtol=1e-3, atol=1e-3)
    np.testing.assert_allclose(np.asarray(dEMdS), ref_dE, rtol=1e-3, atol=1e-3)
    np.testing.assert_allclose(np.asarray(dSMdS), ref_dS, rtol=1e-3, atol=1e-3)

    print("KERNEL_OK")
</pallas_src>

<mosaic_0001>
module attributes {stable_mosaic.version = 11 : i64} {
  func.func @_odefunc_gnn_kernel(%arg0: i32, %arg1: memref<4x128xf32, #tpu.memory_space<vmem>>, %arg2: memref<4x21xf32, #tpu.memory_space<vmem>>, %arg3: memref<6x128xf32, #tpu.memory_space<vmem>>) attributes {dimension_semantics = [#tpu.dimension_semantics<parallel>], iteration_bounds = array<i64: 2>, scalar_prefetch = 0 : i64, scratch_operands = 0 : i64, tpu.core_type = #tpu.core_type<tc>, window_params = [{transform_indices = @transform_0, window_bounds = array<i64: 4, 128>}, {pipeline_mode = #tpu.pipeline_mode<synchronous>, transform_indices = @transform_1, window_bounds = array<i64: 4, 21>}, {transform_indices = @transform_2, window_bounds = array<i64: 6, 128>}]} {
    %c0 = arith.constant 0 : index
    %c0_0 = arith.constant 0 : index
    %0 = vector.load %arg1[%c0, %c0_0] : memref<4x128xf32, #tpu.memory_space<vmem>>, vector<4x128xf32>
    %c0_1 = arith.constant 0 : index
    %c0_2 = arith.constant 0 : index
    %1 = vector.load %arg2[%c0_1, %c0_2] : memref<4x21xf32, #tpu.memory_space<vmem>>, vector<4x21xf32>
    %2 = vector.extract_strided_slice %1 {offsets = [0, 0], sizes = [4, 5], strides = [1, 1]} : vector<4x21xf32> to vector<4x5xf32>
    %3 = vector.extract_strided_slice %1 {offsets = [0, 5], sizes = [4, 2], strides = [1, 1]} : vector<4x21xf32> to vector<4x2xf32>
    %4 = vector.extract_strided_slice %1 {offsets = [0, 7], sizes = [4, 4], strides = [1, 1]} : vector<4x21xf32> to vector<4x4xf32>
    %5 = vector.extract_strided_slice %1 {offsets = [0, 11], sizes = [4, 10], strides = [1, 1]} : vector<4x21xf32> to vector<4x10xf32>
    %6 = vector.extract_strided_slice %3 {offsets = [0, 0], sizes = [4, 1], strides = [1, 1]} : vector<4x2xf32> to vector<4x1xf32>
    %7 = math.cos %0 : vector<4x128xf32>
    %8 = vector.broadcast %6 : vector<4x1xf32> to vector<4x128xf32>
    %9 = arith.mulf %8, %7 : vector<4x128xf32>
    %10 = vector.extract_strided_slice %3 {offsets = [0, 1], sizes = [4, 1], strides = [1, 1]} : vector<4x2xf32> to vector<4x1xf32>
    %11 = math.sin %0 : vector<4x128xf32>
    %12 = vector.broadcast %10 : vector<4x1xf32> to vector<4x128xf32>
    %13 = arith.mulf %12, %11 : vector<4x128xf32>
    %14 = arith.subf %9, %13 : vector<4x128xf32>
    %15 = vector.extract_strided_slice %2 {offsets = [0, 0], sizes = [4, 1], strides = [1, 1]} : vector<4x5xf32> to vector<4x1xf32>
    %16 = vector.broadcast %15 : vector<4x1xf32> to vector<4x128xf32>
    %17 = arith.addf %14, %16 : vector<4x128xf32>
    %18 = vector.extract_strided_slice %2 {offsets = [0, 1], sizes = [4, 1], strides = [1, 1]} : vector<4x5xf32> to vector<4x1xf32>
    %19 = vector.extract_strided_slice %0 {offsets = [0, 0], sizes = [1, 128], strides = [1, 1]} : vector<4x128xf32> to vector<1x128xf32>
    %20 = vector.broadcast %18 : vector<4x1xf32> to vector<4x128xf32>
    %21 = vector.broadcast %19 : vector<1x128xf32> to vector<4x128xf32>
    %22 = arith.mulf %20, %21 : vector<4x128xf32>
    %23 = arith.addf %17, %22 : vector<4x128xf32>
    %24 = vector.extract_strided_slice %2 {offsets = [0, 2], sizes = [4, 1], strides = [1, 1]} : vector<4x5xf32> to vector<4x1xf32>
    %25 = vector.extract_strided_slice %0 {offsets = [1, 0], sizes = [1, 128], strides = [1, 1]} : vector<4x128xf32> to vector<1x128xf32>
    %26 = vector.broadcast %24 : vector<4x1xf32> to vector<4x128xf32>
    %27 = vector.broadcast %25 : vector<1x128xf32> to vector<4x128xf32>
    %28 = arith.mulf %26, %27 : vector<4x128xf32>
    %29 = arith.addf %23, %28 : vector<4x128xf32>
    %30 = vector.extract_strided_slice %2 {offsets = [0, 3], sizes = [4, 1], strides = [1, 1]} : vector<4x5xf32> to vector<4x1xf32>
    %31 = vector.extract_strided_slice %0 {offsets = [2, 0], sizes = [1, 128], strides = [1, 1]} : vector<4x128xf32> to vector<1x128xf32>
    %32 = vector.broadcast %30 : vector<4x1xf32> to vector<4x128xf32>
    %33 = vector.broadcast %31 : vector<1x128xf32> to vector<4x128xf32>
    %34 = arith.mulf %32, %33 : vector<4x128xf32>
    %35 = arith.addf %29, %34 : vector<4x128xf32>
    %36 = vector.extract_strided_slice %2 {offsets = [0, 4], sizes = [4, 1], strides = [1, 1]} : vector<4x5xf32> to vector<4x1xf32>
    %37 = vector.extract_strided_slice %0 {offsets = [3, 0], sizes = [1, 128], strides = [1, 1]} : vector<4x128xf32> to vector<1x128xf32>
    %38 = vector.broadcast %36 : vector<4x1xf32> to vector<4x128xf32>
    %39 = vector.broadcast %37 : vector<1x128xf32> to vector<4x128xf32>
    %40 = arith.mulf %38, %39 : vector<4x128xf32>
    %41 = arith.addf %35, %40 : vector<4x128xf32>
    %42 = vector.extract_strided_slice %4 {offsets = [0, 0], sizes = [4, 1], strides = [1, 1]} : vector<4x4xf32> to vector<4x1xf32>
    %43 = vector.extract_strided_slice %41 {offsets = [0, 0], sizes = [1, 128], strides = [1, 1]} : vector<4x128xf32> to vector<1x128xf32>
    %44 = vector.broadcast %42 : vector<4x1xf32> to vector<4x128xf32>
    %45 = vector.broadcast %43 : vector<1x128xf32> to vector<4x128xf32>
    %46 = arith.mulf %44, %45 : vector<4x128xf32>
    %47 = vector.extract_strided_slice %4 {offsets = [0, 1], sizes = [4, 1], strides = [1, 1]} : vector<4x4xf32> to vector<4x1xf32>
    %48 = vector.extract_strided_slice %41 {offsets = [1, 0], sizes = [1, 128], strides = [1, 1]} : vector<4x128xf32> to vector<1x128xf32>
    %49 = vector.broadcast %47 : vector<4x1xf32> to vector<4x128xf32>
    %50 = vector.broadcast %48 : vector<1x128xf32> to vector<4x128xf32>
    %51 = arith.mulf %49, %50 : vector<4x128xf32>
    %52 = arith.addf %46, %51 : vector<4x128xf32>
    %53 = vector.extract_strided_slice %4 {offsets = [0, 2], sizes = [4, 1], strides = [1, 1]} : vector<4x4xf32> to vector<4x1xf32>
    %54 = vector.extract_strided_slice %41 {offsets = [2, 0], sizes = [1, 128], strides = [1, 1]} : vector<4x128xf32> to vector<1x128xf32>
    %55 = vector.broadcast %53 : vector<4x1xf32> to vector<4x128xf32>
    %56 = vector.broadcast %54 : vector<1x128xf32> to vector<4x128xf32>
    %57 = arith.mulf %55, %56 : vector<4x128xf32>
    %58 = arith.addf %52, %57 : vector<4x128xf32>
    %59 = vector.extract_strided_slice %4 {offsets = [0, 3], sizes = [4, 1], strides = [1, 1]} : vector<4x4xf32> to vector<4x1xf32>
    %60 = vector.extract_strided_slice %41 {offsets = [3, 0], sizes = [1, 128], strides = [1, 1]} : vector<4x128xf32> to vector<1x128xf32>
    %61 = vector.broadcast %59 : vector<4x1xf32> to vector<4x128xf32>
    %62 = vector.broadcast %60 : vector<1x128xf32> to vector<4x128xf32>
    %63 = arith.mulf %61, %62 : vector<4x128xf32>
    %64 = arith.addf %58, %63 : vector<4x128xf32>
    %65 = vector.extract_strided_slice %41 {offsets = [0, 0], sizes = [1, 128], strides = [1, 1]} : vector<4x128xf32> to vector<1x128xf32>
    %66 = vector.extract_strided_slice %41 {offsets = [0, 0], sizes = [1, 128], strides = [1, 1]} : vector<4x128xf32> to vector<1x128xf32>
    %67 = arith.mulf %65, %66 : vector<1x128xf32>
    %68 = vector.extract_strided_slice %5 {offsets = [0, 0], sizes = [4, 1], strides = [1, 1]} : vector<4x10xf32> to vector<4x1xf32>
    %69 = vector.broadcast %68 : vector<4x1xf32> to vector<4x128xf32>
    %70 = vector.broadcast %67 : vector<1x128xf32> to vector<4x128xf32>
    %71 = arith.mulf %69, %70 : vector<4x128xf32>
    %72 = vector.extract_strided_slice %41 {offsets = [0, 0], sizes = [1, 128], strides = [1, 1]} : vector<4x128xf32> to vector<1x128xf32>
    %73 = vector.extract_strided_slice %41 {offsets = [1, 0], sizes = [1, 128], strides = [1, 1]} : vector<4x128xf32> to vector<1x128xf32>
    %74 = arith.mulf %72, %73 : vector<1x128xf32>
    %75 = vector.extract_strided_slice %5 {offsets = [0, 1], sizes = [4, 1], strides = [1, 1]} : vector<4x10xf32> to vector<4x1xf32>
    %76 = vector.broadcast %75 : vector<4x1xf32> to vector<4x128xf32>
    %77 = vector.broadcast %74 : vector<1x128xf32> to vector<4x128xf32>
    %78 = arith.mulf %76, %77 : vector<4x128xf32>
    %79 = arith.addf %71, %78 : vector<4x128xf32>
    %80 = vector.extract_strided_slice %41 {offsets = [0, 0], sizes = [1, 128], strides = [1, 1]} : vector<4x128xf32> to vector<1x128xf32>
    %81 = vector.extract_strided_slice %41 {offsets = [2, 0], sizes = [1, 128], strides = [1, 1]} : vector<4x128xf32> to vector<1x128xf32>
    %82 = arith.mulf %80, %81 : vector<1x128xf32>
    %83 = vector.extract_strided_slice %5 {offsets = [0, 2], sizes = [4, 1], strides = [1, 1]} : vector<4x10xf32> to vector<4x1xf32>
    %84 = vector.broadcast %83 : vector<4x1xf32> to vector<4x128xf32>
    %85 = vector.broadcast %82 : vector<1x128xf32> to vector<4x128xf32>
    %86 = arith.mulf %84, %85 : vector<4x128xf32>
    %87 = arith.addf %79, %86 : vector<4x128xf32>
    %88 = vector.extract_strided_slice %41 {offsets = [0, 0], sizes = [1, 128], strides = [1, 1]} : vector<4x128xf32> to vector<1x128xf32>
    %89 = vector.extract_strided_slice %41 {offsets = [3, 0], sizes = [1, 128], strides = [1, 1]} : vector<4x128xf32> to vector<1x128xf32>
    %90 = arith.mulf %88, %89 : vector<1x128xf32>
    %91 = vector.extract_strided_slice %5 {offsets = [0, 3], sizes = [4, 1], strides = [1, 1]} : vector<4x10xf32> to vector<4x1xf32>
    %92 = vector.broadcast %91 : vector<4x1xf32> to vector<4x128xf32>
    %93 = vector.broadcast %90 : vector<1x128xf32> to vector<4x128xf32>
    %94 = arith.mulf %92, %93 : vector<4x128xf32>
    %95 = arith.addf %87, %94 : vector<4x128xf32>
    %96 = vector.extract_strided_slice %41 {offsets = [1, 0], sizes = [1, 128], strides = [1, 1]} : vector<4x128xf32> to vector<1x128xf32>
    %97 = vector.extract_strided_slice %41 {offsets = [1, 0], sizes = [1, 128], strides = [1, 1]} : vector<4x128xf32> to vector<1x128xf32>
    %98 = arith.mulf %96, %97 : vector<1x128xf32>
    %99 = vector.extract_strided_slice %5 {offsets = [0, 4], sizes = [4, 1], strides = [1, 1]} : vector<4x10xf32> to vector<4x1xf32>
    %100 = vector.broadcast %99 : vector<4x1xf32> to vector<4x128xf32>
    %101 = vector.broadcast %98 : vector<1x128xf32> to vector<4x128xf32>
    %102 = arith.mulf %100, %101 : vector<4x128xf32>
    %103 = arith.addf %95, %102 : vector<4x128xf32>
    %104 = vector.extract_strided_slice %41 {offsets = [1, 0], sizes = [1, 128], strides = [1, 1]} : vector<4x128xf32> to vector<1x128xf32>
    %105 = vector.extract_strided_slice %41 {offsets = [2, 0], sizes = [1, 128], strides = [1, 1]} : vector<4x128xf32> to vector<1x128xf32>
    %106 = arith.mulf %104, %105 : vector<1x128xf32>
    %107 = vector.extract_strided_slice %5 {offsets = [0, 5], sizes = [4, 1], strides = [1, 1]} : vector<4x10xf32> to vector<4x1xf32>
    %108 = vector.broadcast %107 : vector<4x1xf32> to vector<4x128xf32>
    %109 = vector.broadcast %106 : vector<1x128xf32> to vector<4x128xf32>
    %110 = arith.mulf %108, %109 : vector<4x128xf32>
    %111 = arith.addf %103, %110 : vector<4x128xf32>
    %112 = vector.extract_strided_slice %41 {offsets = [1, 0], sizes = [1, 128], strides = [1, 1]} : vector<4x128xf32> to vector<1x128xf32>
    %113 = vector.extract_strided_slice %41 {offsets = [3, 0], sizes = [1, 128], strides = [1, 1]} : vector<4x128xf32> to vector<1x128xf32>
    %114 = arith.mulf %112, %113 : vector<1x128xf32>
    %115 = vector.extract_strided_slice %5 {offsets = [0, 6], sizes = [4, 1], strides = [1, 1]} : vector<4x10xf32> to vector<4x1xf32>
    %116 = vector.broadcast %115 : vector<4x1xf32> to vector<4x128xf32>
    %117 = vector.broadcast %114 : vector<1x128xf32> to vector<4x128xf32>
    %118 = arith.mulf %116, %117 : vector<4x128xf32>
    %119 = arith.addf %111, %118 : vector<4x128xf32>
    %120 = vector.extract_strided_slice %41 {offsets = [2, 0], sizes = [1, 128], strides = [1, 1]} : vector<4x128xf32> to vector<1x128xf32>
    %121 = vector.extract_strided_slice %41 {offsets = [2, 0], sizes = [1, 128], strides = [1, 1]} : vector<4x128xf32> to vector<1x128xf32>
    %122 = arith.mulf %120, %121 : vector<1x128xf32>
    %123 = vector.extract_strided_slice %5 {offsets = [0, 7], sizes = [4, 1], strides = [1, 1]} : vector<4x10xf32> to vector<4x1xf32>
    %124 = vector.broadcast %123 : vector<4x1xf32> to vector<4x128xf32>
    %125 = vector.broadcast %122 : vector<1x128xf32> to vector<4x128xf32>
    %126 = arith.mulf %124, %125 : vector<4x128xf32>
    %127 = arith.addf %119, %126 : vector<4x128xf32>
    %128 = vector.extract_strided_slice %41 {offsets = [2, 0], sizes = [1, 128], strides = [1, 1]} : vector<4x128xf32> to vector<1x128xf32>
    %129 = vector.extract_strided_slice %41 {offsets = [3, 0], sizes = [1, 128], strides = [1, 1]} : vector<4x128xf32> to vector<1x128xf32>
    %130 = arith.mulf %128, %129 : vector<1x128xf32>
    %131 = vector.extract_strided_slice %5 {offsets = [0, 8], sizes = [4, 1], strides = [1, 1]} : vector<4x10xf32> to vector<4x1xf32>
    %132 = vector.broadcast %131 : vector<4x1xf32> to vector<4x128xf32>
    %133 = vector.broadcast %130 : vector<1x128xf32> to vector<4x128xf32>
    %134 = arith.mulf %132, %133 : vector<4x128xf32>
    %135 = arith.addf %127, %134 : vector<4x128xf32>
    %136 = vector.extract_strided_slice %41 {offsets = [3, 0], sizes = [1, 128], strides = [1, 1]} : vector<4x128xf32> to vector<1x128xf32>
    %137 = vector.extract_strided_slice %41 {offsets = [3, 0], sizes = [1, 128], strides = [1, 1]} : vector<4x128xf32> to vector<1x128xf32>
    %138 = arith.mulf %136, %137 : vector<1x128xf32>
    %139 = vector.extract_strided_slice %5 {offsets = [0, 9], sizes = [4, 1], strides = [1, 1]} : vector<4x10xf32> to vector<4x1xf32>
    %140 = vector.broadcast %139 : vector<4x1xf32> to vector<4x128xf32>
    %141 = vector.broadcast %138 : vector<1x128xf32> to vector<4x128xf32>
    %142 = arith.mulf %140, %141 : vector<4x128xf32>
    %143 = arith.addf %135, %142 : vector<4x128xf32>
    %144 = arith.mulf %41, %143 : vector<4x128xf32>
    %cst = arith.constant dense<0.000000e+00> : vector<128xf32>
    %145 = vector.multi_reduction <add>, %144, %cst [0] : vector<4x128xf32> to vector<128xf32>
    %146 = vector.shape_cast %145 : vector<128xf32> to vector<1x128xf32>
    %147 = vector.extract_strided_slice %143 {offsets = [3, 0], sizes = [1, 128], strides = [1, 1]} : vector<4x128xf32> to vector<1x128xf32>
    %148 = arith.addf %64, %143 : vector<4x128xf32>
    %c0_3 = arith.constant 0 : index
    %c0_4 = arith.constant 0 : index
    %149 = vector.load %arg3[%c0_3, %c0_4] : memref<6x128xf32, #tpu.memory_space<vmem>>, vector<4x128xf32>
    tpu.vector_store %arg3[%c0_3, %c0_4], %148 {strides = array<i32>} : memref<6x128xf32, #tpu.memory_space<vmem>>, vector<4x128xf32>,
    %c4 = arith.constant 4 : index
    %c0_5 = arith.constant 0 : index
    %150 = vector.load %arg3[%c4, %c0_5] : memref<6x128xf32, #tpu.memory_space<vmem>>, vector<1x128xf32>
    tpu.vector_store %arg3[%c4, %c0_5], %146 {strides = array<i32>} : memref<6x128xf32, #tpu.memory_space<vmem>>, vector<1x128xf32>,
    %c5 = arith.constant 5 : index
    %c0_6 = arith.constant 0 : index
    %151 = vector.load %arg3[%c5, %c0_6] : memref<6x128xf32, #tpu.memory_space<vmem>>, vector<1x128xf32>
    tpu.vector_store %arg3[%c5, %c0_6], %147 {strides = array<i32>} : memref<6x128xf32, #tpu.memory_space<vmem>>, vector<1x128xf32>,
    return
  }
  func.func @transform_0(%arg0: i32) -> (i32, i32) {
    %c0_i32 = arith.constant 0 : i32
    %c0_i32_0 = arith.constant 0 : i32
    return %c0_i32, %arg0 : i32, i32
  }
  func.func @transform_1(%arg0: i32) -> (i32, i32) {
    %c0_i32 = arith.constant 0 : i32
    %c0_i32_0 = arith.constant 0 : i32
    %c0_i32_1 = arith.constant 0 : i32
    return %c0_i32, %c0_i32_0 : i32, i32
  }
  func.func @transform_2(%arg0: i32) -> (i32, i32) {
    %c0_i32 = arith.constant 0 : i32
    %c0_i32_0 = arith.constant 0 : i32
    return %c0_i32, %arg0 : i32, i32
  }
}

</mosaic_0001>

<bundles_post_ra>
// kernel: tpu_custom_call.1
= control target key start
LH: loop header
LB: loop body
LE: loop exit
PB: predicated region body
PF: predicated region fallthrough
CT: control target
= control target key end

     0   :  { %7 = vsyncpa [#allocation3], 0  ;;  %s1308_s0 = inlined_call_operand.hbm [shape: f32[4,256], index: 0, kind: input, shape index: {}]   ;;  %s1309_s1 = inlined_call_operand.hbm [shape: f32[4,21], index: 1, kind: input, shape index: {}]   ;;  %s1310_s2 = inlined_call_operand.hbm [shape: f32[6,256], index: 2, kind: output, shape index: {}]  }
   0x1   :  { %9 = vsyncpa [#allocation3 + $0x1], 0 }
   0x2   :  { %10 = vsyncpa [#allocation6], 0 }
   0x3   :  { %11 = vsyncpa [#allocation4], 0 }
   0x4   :  { %13 = vsyncpa [#allocation4 + $0x1], 0  ;;  %s1005_s9 = smov 0   ;;  %s1007_s10 = smov 0  }
   0x5   :  { %s1009_s11 = smov 0   ;;  %s1011_s12 = smov 0  }
   0x6 LB: > { %s1026_s13 = sadd.s32 4294967295, %s958_s12   ;;  %s694_s14 = sadd.s32 4294967294, %s958_s12   ;;  %s958_s12 = sphi %s1011_s12, %s1334_s12   ;;  %s954_s11 = sphi %s1009_s11, %s1333_s11   ;;  %s950_s10 = sphi %s1007_s10, %s1332_s10   ;;  %s946_s9 = sphi %s1005_s9, %s1331_s9  }
   0x7   : > { %p39_p0 = scmp.ne.s32.totalorder %s950_s10, %s946_s9  ;;  %p1311_p1 = scmp.eq.s32.totalorder %s1026_s13, 0 }
   0x8   : > { %p90_p3 = scmp.eq.s32.totalorder %s694_s14, 1  ;;  %p695_p5 = scmp.ge.s32.totalorder %s958_s12, 1 }
   0x9   : > { %p1035_p4 = por %p1311_p1, %p39_p0  ;;  %p97_p7 = scmp.lt.s32.totalorder %s958_s12, 3 }
   0xa   : > { %p1040_p6 = por %p90_p3, %p39_p0  ;;  %s960_s18 = smov [#allocation5]  }
   0xb   : > { %s1314_s15 = scalar_select %p1035_p4, 1, 0 }
   0xc   : > { %s1315_s16 = scalar_select %p1040_p6, 1, 0 }
   0xd   : > { %p1045_p8 = pnand %p695_p5, %p97_p7  ;;  %s110_s19 = sshll.u32 %s960_s18, 4  ;;  %s111_s19 = int_to_ptr.vmem [resolvable:$true] %s110_s19 }
   0xe   : > { %s1053_s20 = sadd.s32 1, %s958_s12   ;;  %s26_s24 = sadd.s32 1, %s954_s11 }
   0xf   : > { %s1316_s17 = scalar_select %p1045_p8, 1, 0 }
  0x10   : > { %p728_p10 = pneg %p1045_p8  ;;  %s23_s22 = ssub.s32 %s958_s12, %s1053_s20 }
  0x11   : > { %p1063_p12 = scmp.eq.s32.totalorder %s23_s22, 0  ;;  %s830_s27 = scalar_lea.hbm %s1309_s1, 64 }
  0x12   : > { %p1057_p11 = pnand %p728_p10, %p1311_p1  ;;  %p831_p0 = scmp.ne.s32.totalorder %s1309_s1, %s830_s27 }
  0x13   : > { %s1318_s23 = scalar_select %p1063_p12, 1, 0 }
  0x14   : > { %p832_p3 = pneg %p1057_p11  ;;  %p837_p10 = scmp.lt.u32.totalorder %s830_s27, %s1309_s1 }
  0x16   : > { %p833_p5 = pnand %p832_p3, %p831_p0 }
  0x18   : > { %p834_p7 = pneg %p833_p5 }
  0x1a   : > { %p839_p9 = pnand %p837_p10, %p834_p7 }
  0x1c   : > { %842 = shalt.err (!%p839_p9)
}
  0x1d   : > { %s843_s4 = scalar_lea.vmem %s111_s19, 64  ;;  %p851_p6 = scmp.lt.s32.totalorder %s111_s19, %s111_s19 }
  0x1e   : > { %p844_p1 = scmp.ne.s32.totalorder %s111_s19, %s843_s4  ;;  %p852_p4 = scmp.lt.s32.totalorder %s843_s4, %s843_s4 }
  0x20   : > { %p846_p2 = pnand %p844_p1, %p832_p3  ;;  %p853_p8 = por %p852_p4, %p851_p6 }
  0x22   : > { %p847_p13 = pneg %p846_p2 }
  0x24   : > { %p854_p12 = pnand %p853_p8, %p847_p13 }
  0x26   : > { %857 = shalt.err (!%p854_p12)
}
  0x27   : > { %731 = dma.hbm_to_vmem [thread:$0]  (!%p1057_p11), %s1309_s1, 64, %s111_s19, [#allocation6]  }
  0x28   : > { %p1319_p1 = scmp.ne.s32.totalorder %s1318_s23, 0  ;;  %p34_p2 = scmp.eq.s32.totalorder %s958_s12, 0 }
  0x29   : > { %p1320_p4 = scmp.ne.s32.totalorder %s954_s11, %s950_s10  ;;  %p1321_p6 = scmp.eq.s32.totalorder %s1026_s13, 1 }
  0x2a   : > { %s1089_s7 = scalar_select %p1319_p1, %s954_s11, %s26_s24  }
  0x2b   : > { %p1097_p8 = por %p1321_p6, %p1320_p4  ;;  %p741_p9 = scmp.lt.s32.totalorder %s958_s12, 2 }
  0x2c   : > { %s121_s14 = sand.u32 1, %s954_s11   ;;  %p1323_p12 = pmov %p1320_p4 }
  0x2d   : > { %s698_s18 = sshll.u32 %s121_s14, 2  ;;  %s699_s21 = sshll.u32 %s958_s12, 6 }
  0x2e   : > { %p35_p13 = por %p34_p2, %p1323_p12  ;;  %s1110_s19 = scalar_lea.hbm %s1308_s0, %s699_s21 }
  0x2f   : > { %s125_s23 = scalar_lea.vmem [#allocation2], %s698_s18  ;;  %s122_s27 = scalar_lea.sflag [#allocation3], %s121_s14 }
  0x30   : > { %s132_s24 = sshll.u32 %s125_s23, 4  ;;  %p1112_p11 = pnand %p741_p9, %p35_p13  ;;  %s1116_s24 = int_to_ptr.vmem [resolvable:$true] %s132_s24 }
  0x31   : > { %s858_s28 = scalar_lea.hbm %s1110_s19, 64  ;;  %s863_s3 = scalar_lea.hbm %s1308_s0, 128 }
  0x32   : > { %p859_p0 = scmp.ne.s32.totalorder %s1110_s19, %s858_s28  ;;  %p860_p3 = pneg %p1112_p11 }
  0x33   : > { %p864_p10 = scmp.lt.u32.totalorder %s1110_s19, %s1308_s0  ;;  %p865_p1 = scmp.lt.u32.totalorder %s863_s3, %s858_s28 }
  0x34   : > { %p861_p5 = pnand %p860_p3, %p859_p0  ;;  %p867_p4 = scmp.lt.u32.totalorder %s858_s28, %s1110_s19 }
  0x35   : > { %p866_p2 = por %p865_p1, %p864_p10 }
  0x36   : > { %p862_p7 = pneg %p861_p5 }
  0x37   : > { %p868_p6 = por %p867_p4, %p866_p2 }
  0x39   : > { %p869_p9 = pnand %p868_p6, %p862_p7 }
  0x3b   : > { %872 = shalt.err (!%p869_p9)
}
  0x3c   : > { %s873_s6 = scalar_lea.vmem %s1116_s24, 64  ;;  %s961_s14 = smov [#allocation2]  }
  0x3d   : > { %p874_p12 = scmp.ne.s32.totalorder %s1116_s24, %s873_s6  ;;  %s878_s18 = sshll.u32 %s961_s14, 4  ;;  %s879_s18 = int_to_ptr.vmem [resolvable:$false] %s878_s18 }
  0x3e   : > { %s880_s21 = scalar_lea.vmem %s879_s18, 128  ;;  %p881_p5 = scmp.lt.s32.totalorder %s1116_s24, %s879_s18 }
  0x3f   : > { %p876_p13 = pnand %p874_p12, %p860_p3  ;;  %p882_p10 = scmp.lt.s32.totalorder %s880_s21, %s873_s6 }
  0x41   : > { %p877_p0 = pneg %p876_p13  ;;  %p883_p1 = por %p882_p10, %p881_p5 }
  0x43   : > { %p884_p2 = pnand %p883_p1, %p877_p0 }
  0x45   : > { %887 = shalt.err (!%p884_p2)
}
  0x46   : > { %735 = dma.hbm_to_vmem [thread:$0]  (!%p1112_p11), %s1110_s19, 64, %s1116_s24, %s122_s27  }
  0x47   : > { %p1325_p7 = scmp.ne.s32.totalorder %s1316_s17, 0 }
  0x48   : > { %s1146_s22 = sand.u32 (!%p1325_p7), 1, %s950_s10   ;;  %p1326_p3 = scmp.ne.s32.totalorder (!%p1325_p7), %s1314_s15, 0 }
  0x49   : > { %141 = sbr.rel (%p1325_p7) target bundleno = 297 (0x129), region = 28  ;;  %s701_s25 = sshll.u32 (!%p1325_p7), %s1146_s22, 2 }
  0x4a   : > { %s144_s23 = scalar_lea.sflag (!%p1325_p7), [#allocation3], %s1146_s22  ;;  %s147_s28 = scalar_lea.vmem (!%p1325_p7), [#allocation2], %s701_s25 }
  0x50   : > { %933 = dma.done.wait (%p1326_p3), %s144_s23, 64  }
  0x51   : > { %935 = vsyncadd (%p1326_p3), %s144_s23, 4294967232  ;;  %p1327_p4 = scmp.eq.s32.totalorder %s1026_s13, 0 }
  0x53   : > { %937 = dma.done.wait (%p1327_p4), [#allocation6], 64   ;;  %p1328_p11 = pmov %p1327_p4 }
  0x54   : > { %v962_v0 = vmov 0   ;;  %v963_v1 = vmov 5   ;;  %v1158_v2 = vld [vmem:[#allocation5] sm:$0xf]  ;;  %v1160_v3 = vld [vmem:[%s147_s28] sm:$0xf] }
  0x55   : > { %939 = vsyncadd (%p1328_p11), [#allocation6], 4294967232  ;;  %806 = vset.pattern.permute.xlu1 %v962_v0  ;;  %804 = vset.pattern.permute.xlu0 %v963_v1  ;;  %v177_v4 = vand.u32 2139095040, %v1160_v3  ;;  %v964_v6 = vmov 1   ;;  %v965_v7 = vmov 6   ;;  %v966_v11 = vmov 2  }
  0x56   : > { %394 = vperm.xlu1 %806, %v1158_v2   ;;  %279 = vperm.xlu0 %804, %v1158_v2   ;;  %v174_v9 = vand.u32 2147483647, %v1160_v3  ;;  %v967_v12 = vmov 3   ;;  %v968_v18 = vmov 683565275   ;;  %v973_v28 = vmov 4  }
  0x57   : > { %v178_v5 = vshrl.u32 %v177_v4, 23  ;;  %v969_v20 = vmov 2475754826   ;;  %v970_v22 = vmov 2131351028   ;;  %v974_v29 = vmov 12  }
  0x58   : > { %v181_v14 = vand.u32 8388607, %v174_v9  ;;  %v971_v24 = vmov 2102212464   ;;  %v972_v26 = vmov 920167782   ;;  %vm266_vm15 = vweird.f32 %v1160_v3 }
  0x59   : > { %v704_v8 = vadd.s32 4294967169, %v178_v5  ;;  %v975_v36 = vmov 1326507024   ;;  %v976_v46 = vmov 11   ;;  %v977_v47 = vmov 15   ;;  %s703_s15 = sshll.u32 %s1146_s22, 3 }
  0x5a   : > { %807 = vset.pattern.permute.xlu1 %v964_v6  ;;  %805 = vset.pattern.permute.xlu0 %v965_v7  ;;  %v182_v30 = vor.u32 8388608, %v181_v14  ;;  %v978_v62 = vmov 13   ;;  %v979_v63 = vmov 18   ;;  %v980_v5 = vmov 14   ;;  %s171_s17 = scalar_lea.vmem [#allocation7], %s703_s15  ;;  %s713_s19 = sshll.u32 %s1026_s13, 7 }
  0x5b   : > { %399 = vperm.xlu1 %807, %v1158_v2   ;;  %388 = vperm.xlu0 %805, %v1158_v2   ;;  %v184_v10 = vadd.s32 1, %v704_v8  ;;  %v981_v6 = vmov 7   ;;  %v985_v14 = vmov 20   ;;  %vm176_vm7 = vcmp.lt.s32.totalorder %v1160_v3, 0  ;;  %s614_s24 = sshll.u32 %s171_s17, 4  ;;  %s1264_s29 = scalar_lea.hbm %s1310_s2, %s713_s19  ;;  %s1266_s24 = int_to_ptr.vmem [resolvable:$true] %s614_s24 }
  0x5c   : > { %v222_v45 = vshll.u32 %v182_v30, 8  ;;  %vm175_vm8 = vcmp.le.f32.partialorder %v174_v9, 0.7853982  ;;  %s601_s30 = scalar_lea.sflag [#allocation4], %s1146_s22  ;;  %s888_s3 = scalar_lea.vmem %s1266_s24, 128 }
  0x5d   : > { %vm185_vm0 = vcmp.gt.s32.totalorder %v184_v10, 0  ;;  %p889_p6 = scmp.ne.s32.totalorder %s1266_s24, %s888_s3  ;;  %s989_s13 = smov [#allocation7]  }
  0x5e   : > { %v186_v13 = vsel %vm185_vm0, %v184_v10, 0  ;;  %v982_v10 = vmov 16   ;;  %vm588_vm0 = vcmask 1043456   ;;  %s892_s4 = sshll.u32 %s989_s13, 4  ;;  %s893_s4 = int_to_ptr.vmem [resolvable:$false] %s892_s4 }
  0x5f   : > { %808 = vset.pattern.permute.xlu1 %v966_v11  ;;  %809 = vset.pattern.permute.xlu0 %v967_v12  ;;  %v188_v15 = vand.u32 31, %v186_v13  ;;  %v187_v16 = vshrl.u32 %v186_v13, 5  ;;  %v983_v11 = vmov 10   ;;  %v984_v13 = vmov 17   ;;  %p890_p9 = pnand %p889_p6, %p1097_p8  ;;  %s894_s5 = scalar_lea.vmem %s893_s4, 256 }
  0x60   : > { %409 = vperm.xlu1 %808, %v1158_v2   ;;  %419 = vperm.xlu0 %809, %v1158_v2   ;;  %p895_p13 = scmp.lt.s32.totalorder %s1266_s24, %s893_s4  ;;  %p896_p0 = scmp.lt.s32.totalorder %s894_s5, %s888_s3 }
  0x61   : > { %v189_v17 = vsub.s32 32, %v188_v15  ;;  %v191_v19 = vshll.u32 %v968_v18, %v188_v15  ;;  %v194_v21 = vshll.u32 %v969_v20, %v188_v15  ;;  %v197_v23 = vshll.u32 %v970_v22, %v188_v15  ;;  %p891_p12 = pneg %p890_p9 }
  0x62   : > { %v200_v25 = vshll.u32 %v971_v24, %v188_v15  ;;  %v203_v27 = vshll.u32 %v972_v26, %v188_v15  ;;  %vm206_vm1 = vcmp.lt.s32.totalorder %v187_v16, 1  ;;  %vm209_vm2 = vcmp.lt.s32.totalorder %v187_v16, 4  ;;  %p897_p5 = por %p896_p0, %p895_p13 }
  0x63   : > { %v190_v31 = vshrl.u32 %v968_v18, %v189_v17  ;;  %v192_v32 = vshrl.u32 %v969_v20, %v189_v17  ;;  %v195_v33 = vshrl.u32 %v970_v22, %v189_v17  ;;  %v198_v34 = vshrl.u32 %v971_v24, %v189_v17 }
  0x64   : > { %810 = vset.pattern.permute.xlu1 %v973_v28  ;;  %812 = vset.pattern.permute.xlu0 %v974_v29  ;;  %v201_v35 = vshrl.u32 %v972_v26, %v189_v17  ;;  %v204_v37 = vshrl.u32 %v975_v36, %v189_v17  ;;  %vm208_vm3 = vcmp.lt.s32.totalorder %v187_v16, 3  ;;  %vm207_vm4 = vcmp.lt.s32.totalorder %v187_v16, 2  ;;  %p898_p10 = pnand %p897_p5, %p891_p12 }
  0x65   : > { %429 = vperm.xlu1 %810, %v1158_v2   ;;  %492 = vperm.xlu0 %812, %v1158_v2   ;;  %v193_v38 = vor.u32 %v192_v32, %v191_v19  ;;  %v196_v39 = vor.u32 %v195_v33, %v194_v21  ;;  %v199_v40 = vor.u32 %v198_v34, %v197_v23  ;;  %v986_v16 = vmov 19  }
  0x66   : > { %v202_v41 = vor.u32 %v201_v35, %v200_v25  ;;  %v205_v42 = vor.u32 %v204_v37, %v203_v27  ;;  %v987_v20 = vmov 8   ;;  %v988_v22 = vmov 9  }
  0x67   : > { %v210_v43 = vsel %vm206_vm1, %v190_v31, %v193_v38  ;;  %v214_v44 = vsel %vm206_vm1, %v193_v38, %v196_v39  ;;  %v211_v48 = vsel %vm209_vm2, %v199_v40, 2102212464  ;;  %v218_v50 = vsel %vm206_vm1, %v196_v39, %v199_v40 }
  0x68   : > { %v215_v49 = vsel %vm209_vm2, %v202_v41, 920167782  ;;  %v219_v51 = vsel %vm209_vm2, %v205_v42, 1326507024  ;;  %v212_v52 = vsel %vm208_vm3, %v196_v39, %v211_v48 }
  0x69   : > { %811 = vset.pattern.permute.xlu1 %v976_v46  ;;  %815 = vset.pattern.permute.xlu0 %v977_v47  ;;  %v216_v53 = vsel %vm208_vm3, %v199_v40, %v215_v49  ;;  %v220_v54 = vsel %vm208_vm3, %v202_v41, %v219_v51  ;;  %v213_v55 = vsel %vm207_vm4, %v210_v43, %v212_v52  ;;  %v402_v49 = vlaneseq }
  0x6a   : > { %479 = vperm.xlu1 %811, %v1158_v2   ;;  %528 = vperm.xlu0 %815, %v1158_v2   ;;  %v217_v56 = vsel %vm207_vm4, %v214_v44, %v216_v53  ;;  %v221_v57 = vsel %vm207_vm4, %v218_v50, %v220_v54  ;;  %v229_v0 = vmul.u32 %v222_v45, %v213_v55 }
  0x6b   : > { %v1188_v58 = vmul.u32.u64.low %v222_v45, %v221_v57  ;;  %v1189_v59 = vmul.u32.u64.high %v222_v45, %v221_v57, %v1188_v58  ;;  %v1191_v60 = vmul.u32.u64.low %v222_v45, %v217_v56  ;;  %v1192_v61 = vmul.u32.u64.high %v222_v45, %v217_v56, %v1191_v60 }
  0x6c   : > { %v403_v54 = vshrl.u32 %v402_v49, 7 }
  0x6d   : > { %vm231_vm5 = vc.u32 %v1189_v59, %v1191_v60  ;;  %v232_v1 = vadd.s32 1, %v1192_v61  ;;  %v230_v26 = vadd.s32 %v1191_v60, %v1189_v59 }
  0x6e   : > { %813 = vset.pattern.permute.xlu1 %v978_v62  ;;  %818 = vset.pattern.permute.xlu0 %v979_v63  ;;  %v1214_v59 = vsub.s32 0, %v403_v54  ;;  %v1218_v63 = vsub.s32 2, %v403_v54 }
  0x6f   : > { %505 = vperm.xlu1 %813, %v1158_v2   ;;  %558 = vperm.xlu0 %818, %v1158_v2   ;;  %v233_v4 = vsel %vm231_vm5, %v232_v1, %v1192_v61  ;;  %v1216_v61 = vsub.s32 1, %v403_v54 }
  0x70   : > { %v234_v7 = vadd.s32 %v233_v4, %v229_v0  ;;  %v405_v4 = vrot.slane %v1160_v3, %v1214_v59 }
  0x72   : > { %v235_v8 = vadd.s32 536870912, %v234_v7 }
  0x73   : > { %814 = vset.pattern.permute.xlu1 %v980_v5  ;;  %821 = vset.pattern.permute.xlu0 %v981_v6  ;;  %v415_v6 = vrot.slane %v1160_v3, %v1216_v61 }
  0x74   : > { %518 = vperm.xlu1 %814, %v1158_v2   ;;  %439 = vperm.xlu0 %821, %v1158_v2   ;;  %v236_v12 = vshrl.u32 %v235_v8, 30  ;;  %v425_v8 = vrot.slane %v1160_v3, %v1218_v63 }
  0x76   : > { %v237_v15 = vshll.u32 %v236_v12, 30  ;;  %v260_v39 = vsub.s32 4, %v236_v12 }
  0x78   : > { %816 = vset.pattern.permute.xlu1 %v982_v10  ;;  %824 = vset.pattern.permute.xlu0 %v983_v11  ;;  %v238_v17 = vsub.s32 %v234_v7, %v237_v15  ;;  %v261_v40 = vsel %vm176_vm7, %v260_v39, %v236_v12  ;;  %v1226_v10 = vsub.s32 3, %v403_v54 }
  0x79   : > { %538 = vperm.xlu1 %816, %v1158_v2   ;;  %468 = vperm.xlu0 %824, %v1158_v2   ;;  %v263_v41 = vsel %vm175_vm8, 0, %v261_v40 }
  0x7a   : > { %v240_v18 = vsub.s32 0, %v238_v17  ;;  %v376_v42 = vadd.s32 3, %v263_v41  ;;  %v267_v45 = vand.u32 3, %v263_v41 }
  0x7c   : > { %v705_v19 = vmin.u32 %v240_v18, %v238_v17  ;;  %v377_v46 = vand.u32 3, %v376_v42  ;;  %vm269_vm9 = vcmp.eq.s32.totalorder %v267_v45, 0  ;;  %vm272_vm10 = vcmp.eq.s32.totalorder %v267_v45, 2 }
  0x7d   : > { %817 = vset.pattern.permute.xlu1 %v984_v13  ;;  %825 = vset.pattern.permute.xlu0 %v985_v14  ;;  %vm268_vm13 = vcmp.lt.s32.totalorder %v267_v45, 2  ;;  %v435_v18 = vrot.slane %v1160_v3, %v1226_v10 }
  0x7e   : > { %548 = vperm.xlu1 %817, %v1158_v2   ;;  %v242_v21 = vclz %v705_v19  ;;  %vm379_vm11 = vcmp.eq.s32.totalorder %v377_v46, 0  ;;  %vm382_vm12 = vcmp.eq.s32.totalorder %v377_v46, 2  ;;  %vm378_vm14 = vcmp.lt.s32.totalorder %v377_v46, 2 }
  0x80   : > { %v706_v23 = vadd.s32 4294967294, %v242_v21 }
  0x82   : > { %819 = vset.pattern.permute.xlu1 %v986_v16  ;;  %vm707_vm6 = vcmp.lt.s32.totalorder %v706_v23, 0 }
  0x83   : > { %568 = vperm.xlu1 %819, %v1158_v2   ;;  %v245_v24 = vsel %vm707_vm6, 0, %v706_v23 }
  0x84   : > { %v250_v25 = vsub.s32 4294967266, %v245_v24  ;;  %v246_v27 = vsub.s32 32, %v245_v24  ;;  %v247_v29 = vshll.u32 %v238_v17, %v245_v24 }
  0x86   : > { %v251_v28 = vadd.s32 127, %v250_v25  ;;  %v248_v30 = vshrl.u32 %v230_v26, %v246_v27 }
  0x87   : > { %820 = vset.pattern.permute.xlu1 %v985_v14 }
  0x88   : > { %578 = vperm.xlu1 %820, %v1158_v2   ;;  %v252_v31 = vshll.u32 %v251_v28, 23  ;;  %v249_v32 = vor.u32 %v248_v30, %v247_v29 }
  0x8a   : > { %v253_v33 = vor.u32 4788187, %v252_v31  ;;  %v256_v35 = vcvt.s32.f32 %v249_v32 }
  0x8c   : > { %822 = vset.pattern.permute.xlu1 %v987_v20  ;;  %v254_v34 = vand.u32 2147483647, %v253_v33 }
  0x8d   : > { %448 = vperm.xlu1 %822, %v1158_v2  }
  0x8e   : > { %v257_v36 = vmul.f32 %v256_v35, %v254_v34 }
  0x90   : > { %v258_v37 = vxor.u32 2147483648, %v257_v36 }
  0x91   : > { %823 = vset.pattern.permute.xlu1 %v988_v22 }
  0x92   : > { %458 = vperm.xlu1 %823, %v1158_v2   ;;  %v259_v2 = vsel %vm176_vm7, %v258_v37, %v257_v36 }
  0x93   : > { %v262_v38 = vsel %vm175_vm8, %v1160_v3, %v259_v2 }
  0x94   : > { %826 = vcosq.f32 %v262_v38 }
  0x95   : > { %828 = vsinq.f32 %v262_v38 }
  0x9e   : > { %v827_v43 = vpop.eup %826 }
  0x9f   : > { %v829_v44 = vpop.eup %828  ;;  %v273_v48 = vxor.u32 2147483648, %v827_v43 }
  0xa0   : > { %v270_v47 = vxor.u32 2147483648, %v829_v44 }
  0xa1   : > { %v274_v50 = vsel %vm272_vm10, %v273_v48, %v829_v44  ;;  %v384_v52 = vsel %vm382_vm12, %v273_v48, %v829_v44 }
  0xa2   : > { %v271_v9 = vsel %vm269_vm9, %v827_v43, %v270_v47  ;;  %v381_v51 = vsel %vm379_vm11, %v827_v43, %v270_v47 }
  0xa3   : > { %v275_v53 = vsel %vm268_vm13, %v271_v9, %v274_v50  ;;  %v385_v57 = vsel %vm378_vm14, %v381_v51, %v384_v52 }
  0xa4   : > { %v276_v58 = vsel %vm266_vm15, nan, %v275_v53  ;;  %v386_v60 = vsel %vm266_vm15, nan, %v385_v57 }
  0xd5   : > { %v395_v55 = vpop.permute.xlu1 %394  ;;  %v280_v56 = vpop.permute.xlu0 %279 }
  0xd6   : > { %v282_v62 = vmul.f32 %v280_v56, %v276_v58 }
  0xda   : > { %v400_v0 = vpop.permute.xlu1 %399  ;;  %v389_v1 = vpop.permute.xlu0 %388 }
  0xdb   : > { %v391_v5 = vmul.f32 %v389_v1, %v386_v60  ;;  %v406_v11 = vmul.f32 %v405_v4, %v400_v0 }
  0xdd   : > { %v392_v7 = vsub.f32 %v282_v62, %v391_v5 }
  0xdf   : > { %v397_v12 = vadd.f32 %v395_v55, %v392_v7  ;;  %v410_v13 = vpop.permute.xlu1 %409  ;;  %v420_v14 = vpop.permute.xlu0 %419 }
  0xe0   : > { %v416_v15 = vmul.f32 %v415_v6, %v410_v13  ;;  %v426_v17 = vmul.f32 %v425_v8, %v420_v14 }
  0xe1   : > { %v407_v16 = vadd.f32 %v406_v11, %v397_v12 }
  0xe3   : > { %v417_v19 = vadd.f32 %v416_v15, %v407_v16 }
  0xe4   : > { %v430_v20 = vpop.permute.xlu1 %429  ;;  %v493_v33 = vpop.permute.xlu0 %492 }
  0xe5   : > { %v427_v21 = vadd.f32 %v426_v17, %v417_v19  ;;  %v436_v22 = vmul.f32 %v435_v18, %v430_v20 }
  0xe7   : > { %v1230_v23 = vadd.f32 %v436_v22, %v427_v21 }
  0xe9   : > { %v488_v24 = vrot.slane %v1230_v23, 1  ;;  %v480_v25 = vpop.permute.xlu1 %479  ;;  %v477_v26 = vmul.f32 %v1230_v23, %v1230_v23  ;;  %v501_v27 = vrot.slane %v1230_v23, 2  ;;  %v514_v28 = vrot.slane %v1230_v23, 3  ;;  %v529_v45 = vpop.permute.xlu0 %528 }
  0xea   : > { %v454_v13 = vrot.slane %v1230_v23, %v1216_v61  ;;  %v445_v14 = vrot.slane %v1230_v23, %v1214_v59  ;;  %v464_v19 = vrot.slane %v1230_v23, %v1218_v63 }
  0xeb   : > { %v490_v29 = vmul.f32 %v488_v24, %v1230_v23  ;;  %v485_v3 = vrot.slane %v477_v26, %v1214_v59  ;;  %v503_v30 = vmul.f32 %v501_v27, %v1230_v23  ;;  %v516_v35 = vmul.f32 %v514_v28, %v1230_v23 }
  0xec   : > { %v534_v42 = vrot.slane %v477_v26, %v1216_v61  ;;  %v564_v55 = vrot.slane %v477_v26, %v1218_v63  ;;  %v584_v1 = vrot.slane %v477_v26, %v1226_v10  ;;  %v474_v24 = vrot.slane %v1230_v23, %v1226_v10 }
  0xed   : > { %v498_v31 = vrot.slane %v490_v29, %v1214_v59  ;;  %v511_v32 = vrot.slane %v503_v30, %v1214_v59  ;;  %v486_v37 = vmul.f32 %v485_v3, %v480_v25  ;;  %v524_v39 = vrot.slane %v516_v35, %v1214_v59 }
  0xee   : > { %v506_v34 = vpop.permute.xlu1 %505  ;;  %v535_v46 = vmul.f32 %v534_v42, %v529_v45  ;;  %v544_v48 = vrot.slane %v490_v29, %v1216_v61  ;;  %v554_v50 = vrot.slane %v503_v30, %v1216_v61  ;;  %v559_v54 = vpop.permute.xlu0 %558  ;;  %v574_v60 = vrot.slane %v490_v29, %v1218_v63 }
  0xef   : > { %v499_v36 = vmul.f32 %v498_v31, %v493_v33  ;;  %v512_v38 = vmul.f32 %v511_v32, %v506_v34  ;;  %v565_v57 = vmul.f32 %v564_v55, %v559_v54 }
  0xf1   : > { %v500_v2 = vadd.f32 %v499_v36, %v486_v37 }
  0xf3   : > { %v513_v40 = vadd.f32 %v512_v38, %v500_v2  ;;  %v519_v41 = vpop.permute.xlu1 %518  ;;  %v440_v8 = vpop.permute.xlu0 %439 }
  0xf4   : > { %v525_v43 = vmul.f32 %v524_v39, %v519_v41  ;;  %v446_v18 = vmul.f32 %v445_v14, %v440_v8 }
  0xf6   : > { %v526_v44 = vadd.f32 %v525_v43, %v513_v40 }
  0xf8   : > { %v539_v47 = vpop.permute.xlu1 %538  ;;  %v536_v49 = vadd.f32 %v535_v46, %v526_v44  ;;  %v469_v20 = vpop.permute.xlu0 %468 }
  0xf9   : > { %v545_v9 = vmul.f32 %v544_v48, %v539_v47  ;;  %v475_v27 = vmul.f32 %v474_v24, %v469_v20 }
  0xfb   : > { %v546_v52 = vadd.f32 %v545_v9, %v536_v49 }
  0xfd   : > { %v549_v51 = vpop.permute.xlu1 %548 }
  0xfe   : > { %v555_v53 = vmul.f32 %v554_v50, %v549_v51 }
 0x100   : > { %v556_v56 = vadd.f32 %v555_v53, %v546_v52 }
 0x102   : > { %v569_v58 = vpop.permute.xlu1 %568  ;;  %v566_v62 = vadd.f32 %v565_v57, %v556_v56 }
 0x103   : > { %v575_v0 = vmul.f32 %v574_v60, %v569_v58 }
 0x105   : > { %v576_v5 = vadd.f32 %v575_v0, %v566_v62 }
 0x107   : > { %v579_v4 = vpop.permute.xlu1 %578 }
 0x108   : > { %v585_v6 = vmul.f32 %v584_v1, %v579_v4 }
 0x10a   : > { %v586_v7 = vadd.f32 %v585_v6, %v576_v5 }
 0x10c   : > { %v587_v11 = vmul.f32 %v586_v7, %v1230_v23  ;;  %599 = vst [vmem:[%s171_s17 + $0x2] sm:$0x8] %v586_v7  ;;  %v449_v12 = vpop.permute.xlu1 %448 }
 0x10d   : > { %v455_v16 = vmul.f32 %v454_v13, %v449_v12 }
 0x10e   : > { %v589_v15 = vsel %vm588_vm0, %v587_v11, 0.0 }
 0x10f   : > { %v590_v17 = vrot.slane %v589_v15, 4  ;;  %v456_v25 = vadd.f32 %v455_v16, %v446_v18 }
 0x111   : > { %v591_v21 = vadd.f32 %v590_v17, %v589_v15  ;;  %v459_v22 = vpop.permute.xlu1 %458 }
 0x112   : > { %v465_v61 = vmul.f32 %v464_v19, %v459_v22 }
 0x113   : > { %v592_v26 = vrot.slane %v591_v21, 2 }
 0x114   : > { %v466_v59 = vadd.f32 %v465_v61, %v456_v25 }
 0x115   : > { %v593_v28 = vadd.f32 %v592_v26, %v591_v21 }
 0x116   : > { %v476_v29 = vadd.f32 %v475_v27, %v466_v59 }
 0x117   : > { %v594_v3 = vrot.slane %v593_v28, 1 }
 0x118   : > { %v596_v30 = vadd.f32 %v586_v7, %v476_v29 }
 0x119   : > { %v595_v63 = vadd.f32 %v594_v3, %v593_v28 }
 0x11a   : > { %597 = vst [vmem:[%s171_s17] sm:$0xf] %v596_v30 }
 0x11b   : > { %598 = vst [vmem:[%s171_s17 + $0x4] sm:$0x1] %v595_v63 }
 0x11c   : > { %901 = shalt.err (!%p898_p10)
}
 0x11d   : > { %s902_s6 = scalar_lea.hbm %s1264_s29, 128  ;;  %s906_s21 = scalar_lea.hbm %s1310_s2, 256 }
 0x11e   : > { %p903_p1 = scmp.ne.s32.totalorder %s1264_s29, %s902_s6  ;;  %p907_p3 = scmp.lt.u32.totalorder %s1264_s29, %s1310_s2 }
 0x11f   : > { %p908_p4 = scmp.lt.u32.totalorder %s906_s21, %s902_s6  ;;  %p910_p6 = scmp.lt.u32.totalorder %s902_s6, %s1264_s29 }
 0x120   : > { %p904_p2 = pnand %p903_p1, %p1097_p8 }
 0x121   : > { %p909_p11 = por %p908_p4, %p907_p3 }
 0x122   : > { %p905_p7 = pneg %p904_p2 }
 0x123   : > { %p911_p9 = por %p910_p6, %p909_p11 }
 0x125   : > { %p912_p12 = pnand %p911_p9, %p905_p7 }
 0x127   : > { %915 = shalt.err (!%p912_p12)
}
 0x128   : > { %726 = dma.vmem_to_hbm [thread:$0]  (%p1097_p8), %s1266_s24, 128, %s1264_s29, %s601_s30  }
 0x129 PF: > { %s626_s23 = sand.u32 1, %s946_s9   ;;  %p1329_p13 = scmp.ne.s32.totalorder %s1315_s16, 0 }
 0x12a   : > { %p1330_p0 = scmp.ge.s32.totalorder %s958_s12, 2  ;;  %s627_s28 = scalar_lea.sflag [#allocation4], %s626_s23 }
 0x12c   : > { %p737_p5 = pnand %p1330_p0, %p1329_p13 }
 0x12e   : > { %941 = dma.done.wait (!%p737_p5), %s627_s28, 128  }
 0x12f   : > { %943 = vsyncadd (!%p737_p5), %s627_s28, 4294967168  ;;  %p16_p10 = scmp.ge.s32.totalorder %s1053_s20, 4   ;;  %s1331_s9 = smov %s950_s10 }
 0x130   : > { %s1332_s10 = smov %s954_s11  ;;  %s1333_s11 = smov %s1089_s7 }
 0x131   : > { %s1334_s12 = smov %s1053_s20  ;;  %18 = sbr.rel (!%p16_p10) target bundleno = 6 (0x6), region = 77 }
 0x138   :  { %632 = vsyncpa [#allocation3], 1 }
 0x139   :  { %634 = vsyncpa [#allocation3 + $0x1], 1 }
 0x13a   :  { %635 = vsyncpa [#allocation6], 1 }
 0x13b   :  { %636 = vsyncpa [#allocation4], 1 }
 0x13c   :  { %638 = vsyncpa [#allocation4 + $0x1], 1 }

</bundles_post_ra>
